<compile_context>
chip_gen: v5e
topology: v5e:2x2
jax: 0.10.0
libtpu: 0.0.40
codegen_flags: <defaults>
</compile_context>

<pallas_src>
import functools

import jax
import jax.numpy as jnp
from jax import lax
from jax.experimental import pallas as pl
from jax.experimental.pallas import tpu as pltpu


_LAG_UNROLL_MAX = 64     # fully unroll the lag loop up to this many taps


def long_conv_kernel(x_ref, k_ref, o_ref, pad_ref, *, tt, lag_unroll):
    """One (hidden-tile, batch) block.

    x_ref:   (1, L, TH)  input block
    k_ref:   (L, TH)     filter, transposed (tap/lag index on the sublane axis)
    o_ref:   (1, L, TH)  output block
    pad_ref: (2L, TH)    f32 scratch: rows [0, L) zeros, rows [L, 2L) hold x
    """
    L, TH = k_ref.shape

    # Zero-padded history.  The scratch persists across grid steps (and cores),
    # so both regions are rewritten every step -- cheap vs. the O(L^2) lag work.
    pad_ref[pl.ds(0, L), :] = jnp.zeros((L, TH), jnp.float32)
    pad_ref[pl.ds(L, L), :] = x_ref[0].astype(jnp.float32)

    def lag_step(s, t0, acc):
        # shifted[t, :] = x[t0 + t - s, :] for t0 + t >= s, else 0 (zero prefix).
        shifted = pad_ref[pl.ds(L + t0 - s, tt), :]
        # (1, TH) lag-s tap: the sublane-size-1 operand is hoisted once per lag
        # and broadcast across the chunk rows inside the multiply.
        tap = k_ref[pl.ds(s, 1), :].astype(jnp.float32)
        return acc + shifted * tap

    def chunk_body(c, carry):
        t0 = c * tt
        if not isinstance(c, int):
            t0 = pl.multiple_of(t0, tt)
        acc = jnp.zeros((tt, TH), jnp.float32)
        if lag_unroll:
            # Static unroll: every tap offset is a compile-time constant, so
            # adjacent lags' loads and FMAs pack into the same VLIW bundles.
            for s in range(L):
                acc = lag_step(s, t0, acc)
        else:
            acc = lax.fori_loop(0, L, lambda s, a: lag_step(s, t0, a), acc,
                                unroll=8)
        # Residual comes straight from the padded scratch so x is never held
        # live across the lag loop (frees (L/8)*(TH/128) vregs).
        res_start = L + t0
        if not isinstance(res_start, int) and L % 8 == 0 and tt % 8 == 0:
            res_start = pl.multiple_of(res_start, 8)
        y = acc + pad_ref[pl.ds(res_start, tt), :]
        o_ref[0, pl.ds(t0, tt), :] = y.astype(o_ref.dtype)
        return carry

    num_chunks = L // tt
    if num_chunks == 1:
        chunk_body(0, 0)
    else:
        lax.fori_loop(0, num_chunks, chunk_body, 0)


def _choose_time_chunk(L):
    # 16-row time chunks: each tap broadcast / shifted load is reused across two
    # sublane rows (keeps v5e's 2-wide vld issue unsaturated) while the live f32
    # accumulator stays at ~2*TH/128 vregs.
    for tt in (16, 8):
        if L % tt == 0:
            return tt
    return L                         # odd L: single whole-length chunk


def _per_step_vmem_bytes(L, TH, x_itemsize):
    io_blocks = 2 * (2 * L * TH * x_itemsize)      # x + out blocks, double-buffered
    filt_blk = 2 * (L * TH * 4)                    # f32 filter block, double-buffered
    pad = 2 * L * TH * 4                           # (2L, TH) f32 padded-history scratch
    return io_blocks + filt_blk + pad + (1 << 20)  # +1 MiB slack for temporaries


def _choose_hidden_tile(L, H, x_itemsize, budget_bytes, batch):
    """Largest lane-dense (multiple of 128) divisor of H, <= 1024, whose per-step
    VMEM footprint fits `budget_bytes`, preferring tiles that leave >= 4 total
    grid steps so both v7x TensorCores get work and the pipeline has slack."""
    if H % 128 != 0:
        return H                                   # full-extent block is the only legal option
    cands = [d for d in range(128, min(H, 1024) + 1, 128) if H % d == 0]
    if not cands:
        return H
    fitting = [d for d in cands
               if _per_step_vmem_bytes(L, d, x_itemsize) <= budget_bytes]
    pool = fitting if fitting else [min(cands)]    # huge-L fallback: smallest legal tile
    multi = [d for d in pool if batch * (H // d) >= 4]
    return max(multi) if multi else max(pool)


def _vmem_limits():
    """(physical VMEM per core, tile-selection budget, vmem_limit cap)."""
    try:
        cap = int(pltpu.get_tpu_info().vmem_capacity_bytes)
    except Exception:
        cap = 128 * 1024 * 1024
    if cap <= 64 * 1024 * 1024:                    # v7x: 64 MiB per TensorCore
        return cap, 20 * 1024 * 1024, 32 * 1024 * 1024
    return cap, 40 * 1024 * 1024, 48 * 1024 * 1024  # v5e / v6e: 128 MiB


def long_convolution(x, filt):
    """x: [B, L, H]; filt: [H, max_len] with max_len >= L (module uses max_len == L)."""
    B, L, H = x.shape
    assert filt.shape[0] == H and filt.shape[1] >= L, "filter must be [H, max_len >= L]"
    # Only the first L taps can contribute to a causal length-L output.
    filt_t = jnp.transpose(filt)[:L].astype(jnp.float32)       # (L, H)

    cap, tile_budget, limit_cap = _vmem_limits()
    TH = _choose_hidden_tile(L, H, x.dtype.itemsize, tile_budget, B)
    grid = (H // TH, B)                                          # h outer, b inner

    est = _per_step_vmem_bytes(L, TH, x.dtype.itemsize)
    vmem_limit = min(max(est + est // 4, 32 * 1024 * 1024), limit_cap)
    if vmem_limit < est + est // 8:                 # never set the limit below the footprint
        vmem_limit = min(est + est // 4, int(0.85 * cap))
    vmem_limit = int(vmem_limit)

    tt = _choose_time_chunk(L)
    kernel = functools.partial(long_conv_kernel, tt=tt,
                               lag_unroll=(L <= _LAG_UNROLL_MAX))

    cost = pl.CostEstimate(
        flops=2 * B * L * L * H,                    # one MAC per (b, t, s, h)
        transcendentals=0,
        bytes_accessed=2 * B * L * H * x.dtype.itemsize + L * H * 4,
    )

    return pl.pallas_call(
        kernel,
        out_shape=jax.ShapeDtypeStruct((B, L, H), x.dtype),
        grid_spec=pltpu.PrefetchScalarGridSpec(
            num_scalar_prefetch=0,
            grid=grid,
            in_specs=[
                pl.BlockSpec((1, L, TH), lambda h, b: (b, 0, h)),
                # Filter index depends only on the OUTER h axis, so Pallas skips
                # its re-fetch across the inner batch loop.  pipeline_mode=
                # pl.Buffered(1) would also drop its redundant second VMEM
                # buffer; left off for lowering robustness (budget above already
                # accounts for 2 buffers).
                pl.BlockSpec((L, TH), lambda h, b: (0, h)),
            ],
            out_specs=pl.BlockSpec((1, L, TH), lambda h, b: (b, 0, h)),
            scratch_shapes=[pltpu.VMEM((2 * L, TH), jnp.float32)],
        ),
        compiler_params=pltpu.CompilerParams(
            dimension_semantics=("parallel", "parallel"),
            vmem_limit_bytes=vmem_limit,
        ),
        cost_estimate=cost,
    )(x, filt_t)


def ref_long_convolution(x, filt):
    """Pure-JAX reference mirroring the PyTorch fft_conv path exactly."""
    u = jnp.transpose(x, (0, 2, 1))                 # (B, H, L), like torch NCW
    L = u.shape[-1]
    n = 2 * L
    k_f = jnp.fft.rfft(filt, n=n) / n
    u_f = jnp.fft.rfft(u.astype(filt.dtype), n=n)
    y = jnp.fft.irfft(u_f * k_f, n=n, norm="forward")[..., :L]
    out = y + u
    return jnp.transpose(out, (0, 2, 1)).astype(x.dtype)


if __name__ == "__main__":
    key = jax.random.PRNGKey(0)
    B, L, H = 2, 32, 256            # batch, seq_len (== max_len), hidden_size
    kx, kf = jax.random.split(key)
    x = jax.random.normal(kx, (B, L, H), dtype=jnp.float32)
    # nn.Parameter(torch.randn(hidden_size, max_len)) -> deterministic synthetic init
    filt = jax.random.normal(kf, (H, L), dtype=jnp.float32)

    y = long_convolution(x, filt)
    jax.block_until_ready(y)

    y_ref = ref_long_convolution(x, filt)
    assert y.shape == (B, L, H) and y.dtype == x.dtype
    assert jnp.allclose(y, y_ref, atol=2e-3, rtol=2e-3), float(jnp.max(jnp.abs(y - y_ref)))
    print("KERNEL_OK")
</pallas_src>

<mosaic_0001>
module attributes {stable_mosaic.version = 11 : i64} {
  func.func @long_conv_kernel(%arg0: i32, %arg1: i32, %arg2: memref<1x32x128xf32, #tpu.memory_space<vmem>>, %arg3: memref<32x128xf32, #tpu.memory_space<vmem>>, %arg4: memref<1x32x128xf32, #tpu.memory_space<vmem>>, %arg5: memref<64x128xf32, #tpu.memory_space<vmem>>) attributes {dimension_semantics = [#tpu.dimension_semantics<parallel>, #tpu.dimension_semantics<parallel>], iteration_bounds = array<i64: 2, 2>, scalar_prefetch = 0 : i64, scratch_operands = 1 : i64, tpu.core_type = #tpu.core_type<tc>, window_params = [{transform_indices = @transform_0, window_bounds = array<i64: 1, 32, 128>}, {transform_indices = @transform_1, window_bounds = array<i64: 32, 128>}, {transform_indices = @transform_2, window_bounds = array<i64: 1, 32, 128>}]} {
    %cst = arith.constant 0.000000e+00 : f32
    %0 = vector.broadcast %cst : f32 to vector<32x128xf32>
    %c0 = arith.constant 0 : index
    %c0_0 = arith.constant 0 : index
    %1 = vector.load %arg5[%c0, %c0_0] : memref<64x128xf32, #tpu.memory_space<vmem>>, vector<32x128xf32>
    tpu.vector_store %arg5[%c0, %c0_0], %0 {strides = array<i32>} : memref<64x128xf32, #tpu.memory_space<vmem>>, vector<32x128xf32>,
    %c0_1 = arith.constant 0 : index
    %c0_2 = arith.constant 0 : index
    %c0_3 = arith.constant 0 : index
    %2 = vector.load %arg2[%c0_1, %c0_2, %c0_3] : memref<1x32x128xf32, #tpu.memory_space<vmem>>, vector<1x32x128xf32>
    %3 = vector.shape_cast %2 : vector<1x32x128xf32> to vector<32x128xf32>
    %c32 = arith.constant 32 : index
    %c0_4 = arith.constant 0 : index
    %4 = vector.load %arg5[%c32, %c0_4] : memref<64x128xf32, #tpu.memory_space<vmem>>, vector<32x128xf32>
    tpu.vector_store %arg5[%c32, %c0_4], %3 {strides = array<i32>} : memref<64x128xf32, #tpu.memory_space<vmem>>, vector<32x128xf32>,
    %c0_i32 = arith.constant 0 : i32
    %c2_i32 = arith.constant 2 : i32
    %5 = arith.addi %c0_i32, %c2_i32 : i32
    %c1_i32 = arith.constant 1 : i32
    scf.for %arg6 = %c0_i32 to %5 step %c1_i32  : i32 {
      %c16_i32 = arith.constant 16 : i32
      %6 = arith.muli %arg6, %c16_i32 : i32
      %7 = tpu.assume_multiple %6, 16 : i32
      %cst_6 = arith.constant 0.000000e+00 : f32
      %8 = vector.broadcast %cst_6 : f32 to vector<16x128xf32>
      %c32_i32 = arith.constant 32 : i32
      %9 = arith.addi %c32_i32, %7 : i32
      %c0_i32_7 = arith.constant 0 : i32
      %10 = arith.subi %9, %c0_i32_7 : i32
      %11 = arith.index_cast %10 : i32 to index
      %c0_8 = arith.constant 0 : index
      %12 = vector.load %arg5[%11, %c0_8] : memref<64x128xf32, #tpu.memory_space<vmem>>, vector<16x128xf32>
      %c0_9 = arith.constant 0 : index
      %c0_10 = arith.constant 0 : index
      %13 = vector.load %arg3[%c0_9, %c0_10] : memref<32x128xf32, #tpu.memory_space<vmem>>, vector<1x128xf32>
      %14 = vector.broadcast %13 : vector<1x128xf32> to vector<16x128xf32>
      %15 = arith.mulf %12, %14 : vector<16x128xf32>
      %16 = arith.addf %8, %15 : vector<16x128xf32>
      %c32_i32_11 = arith.constant 32 : i32
      %17 = arith.addi %c32_i32_11, %7 : i32
      %c1_i32_12 = arith.constant 1 : i32
      %18 = arith.subi %17, %c1_i32_12 : i32
      %19 = arith.index_cast %18 : i32 to index
      %c0_13 = arith.constant 0 : index
      %20 = vector.load %arg5[%19, %c0_13] : memref<64x128xf32, #tpu.memory_space<vmem>>, vector<16x128xf32>
      %c1 = arith.constant 1 : index
      %c0_14 = arith.constant 0 : index
      %21 = vector.load %arg3[%c1, %c0_14] : memref<32x128xf32, #tpu.memory_space<vmem>>, vector<1x128xf32>
      %22 = vector.broadcast %21 : vector<1x128xf32> to vector<16x128xf32>
      %23 = arith.mulf %20, %22 : vector<16x128xf32>
      %24 = arith.addf %16, %23 : vector<16x128xf32>
      %c32_i32_15 = arith.constant 32 : i32
      %25 = arith.addi %c32_i32_15, %7 : i32
      %c2_i32_16 = arith.constant 2 : i32
      %26 = arith.subi %25, %c2_i32_16 : i32
      %27 = arith.index_cast %26 : i32 to index
      %c0_17 = arith.constant 0 : index
      %28 = vector.load %arg5[%27, %c0_17] : memref<64x128xf32, #tpu.memory_space<vmem>>, vector<16x128xf32>
      %c2 = arith.constant 2 : index
      %c0_18 = arith.constant 0 : index
      %29 = vector.load %arg3[%c2, %c0_18] : memref<32x128xf32, #tpu.memory_space<vmem>>, vector<1x128xf32>
      %30 = vector.broadcast %29 : vector<1x128xf32> to vector<16x128xf32>
      %31 = arith.mulf %28, %30 : vector<16x128xf32>
      %32 = arith.addf %24, %31 : vector<16x128xf32>
      %c32_i32_19 = arith.constant 32 : i32
      %33 = arith.addi %c32_i32_19, %7 : i32
      %c3_i32 = arith.constant 3 : i32
      %34 = arith.subi %33, %c3_i32 : i32
      %35 = arith.index_cast %34 : i32 to index
      %c0_20 = arith.constant 0 : index
      %36 = vector.load %arg5[%35, %c0_20] : memref<64x128xf32, #tpu.memory_space<vmem>>, vector<16x128xf32>
      %c3 = arith.constant 3 : index
      %c0_21 = arith.constant 0 : index
      %37 = vector.load %arg3[%c3, %c0_21] : memref<32x128xf32, #tpu.memory_space<vmem>>, vector<1x128xf32>
      %38 = vector.broadcast %37 : vector<1x128xf32> to vector<16x128xf32>
      %39 = arith.mulf %36, %38 : vector<16x128xf32>
      %40 = arith.addf %32, %39 : vector<16x128xf32>
      %c32_i32_22 = arith.constant 32 : i32
      %41 = arith.addi %c32_i32_22, %7 : i32
      %c4_i32 = arith.constant 4 : i32
      %42 = arith.subi %41, %c4_i32 : i32
      %43 = arith.index_cast %42 : i32 to index
      %c0_23 = arith.constant 0 : index
      %44 = vector.load %arg5[%43, %c0_23] : memref<64x128xf32, #tpu.memory_space<vmem>>, vector<16x128xf32>
      %c4 = arith.constant 4 : index
      %c0_24 = arith.constant 0 : index
      %45 = vector.load %arg3[%c4, %c0_24] : memref<32x128xf32, #tpu.memory_space<vmem>>, vector<1x128xf32>
      %46 = vector.broadcast %45 : vector<1x128xf32> to vector<16x128xf32>
      %47 = arith.mulf %44, %46 : vector<16x128xf32>
      %48 = arith.addf %40, %47 : vector<16x128xf32>
      %c32_i32_25 = arith.constant 32 : i32
      %49 = arith.addi %c32_i32_25, %7 : i32
      %c5_i32 = arith.constant 5 : i32
      %50 = arith.subi %49, %c5_i32 : i32
      %51 = arith.index_cast %50 : i32 to index
      %c0_26 = arith.constant 0 : index
      %52 = vector.load %arg5[%51, %c0_26] : memref<64x128xf32, #tpu.memory_space<vmem>>, vector<16x128xf32>
      %c5 = arith.constant 5 : index
      %c0_27 = arith.constant 0 : index
      %53 = vector.load %arg3[%c5, %c0_27] : memref<32x128xf32, #tpu.memory_space<vmem>>, vector<1x128xf32>
      %54 = vector.broadcast %53 : vector<1x128xf32> to vector<16x128xf32>
      %55 = arith.mulf %52, %54 : vector<16x128xf32>
      %56 = arith.addf %48, %55 : vector<16x128xf32>
      %c32_i32_28 = arith.constant 32 : i32
      %57 = arith.addi %c32_i32_28, %7 : i32
      %c6_i32 = arith.constant 6 : i32
      %58 = arith.subi %57, %c6_i32 : i32
      %59 = arith.index_cast %58 : i32 to index
      %c0_29 = arith.constant 0 : index
      %60 = vector.load %arg5[%59, %c0_29] : memref<64x128xf32, #tpu.memory_space<vmem>>, vector<16x128xf32>
      %c6 = arith.constant 6 : index
      %c0_30 = arith.constant 0 : index
      %61 = vector.load %arg3[%c6, %c0_30] : memref<32x128xf32, #tpu.memory_space<vmem>>, vector<1x128xf32>
      %62 = vector.broadcast %61 : vector<1x128xf32> to vector<16x128xf32>
      %63 = arith.mulf %60, %62 : vector<16x128xf32>
      %64 = arith.addf %56, %63 : vector<16x128xf32>
      %c32_i32_31 = arith.constant 32 : i32
      %65 = arith.addi %c32_i32_31, %7 : i32
      %c7_i32 = arith.constant 7 : i32
      %66 = arith.subi %65, %c7_i32 : i32
      %67 = arith.index_cast %66 : i32 to index
      %c0_32 = arith.constant 0 : index
      %68 = vector.load %arg5[%67, %c0_32] : memref<64x128xf32, #tpu.memory_space<vmem>>, vector<16x128xf32>
      %c7 = arith.constant 7 : index
      %c0_33 = arith.constant 0 : index
      %69 = vector.load %arg3[%c7, %c0_33] : memref<32x128xf32, #tpu.memory_space<vmem>>, vector<1x128xf32>
      %70 = vector.broadcast %69 : vector<1x128xf32> to vector<16x128xf32>
      %71 = arith.mulf %68, %70 : vector<16x128xf32>
      %72 = arith.addf %64, %71 : vector<16x128xf32>
      %c32_i32_34 = arith.constant 32 : i32
      %73 = arith.addi %c32_i32_34, %7 : i32
      %c8_i32 = arith.constant 8 : i32
      %74 = arith.subi %73, %c8_i32 : i32
      %75 = arith.index_cast %74 : i32 to index
      %c0_35 = arith.constant 0 : index
      %76 = vector.load %arg5[%75, %c0_35] : memref<64x128xf32, #tpu.memory_space<vmem>>, vector<16x128xf32>
      %c8 = arith.constant 8 : index
      %c0_36 = arith.constant 0 : index
      %77 = vector.load %arg3[%c8, %c0_36] : memref<32x128xf32, #tpu.memory_space<vmem>>, vector<1x128xf32>
      %78 = vector.broadcast %77 : vector<1x128xf32> to vector<16x128xf32>
      %79 = arith.mulf %76, %78 : vector<16x128xf32>
      %80 = arith.addf %72, %79 : vector<16x128xf32>
      %c32_i32_37 = arith.constant 32 : i32
      %81 = arith.addi %c32_i32_37, %7 : i32
      %c9_i32 = arith.constant 9 : i32
      %82 = arith.subi %81, %c9_i32 : i32
      %83 = arith.index_cast %82 : i32 to index
      %c0_38 = arith.constant 0 : index
      %84 = vector.load %arg5[%83, %c0_38] : memref<64x128xf32, #tpu.memory_space<vmem>>, vector<16x128xf32>
      %c9 = arith.constant 9 : index
      %c0_39 = arith.constant 0 : index
      %85 = vector.load %arg3[%c9, %c0_39] : memref<32x128xf32, #tpu.memory_space<vmem>>, vector<1x128xf32>
      %86 = vector.broadcast %85 : vector<1x128xf32> to vector<16x128xf32>
      %87 = arith.mulf %84, %86 : vector<16x128xf32>
      %88 = arith.addf %80, %87 : vector<16x128xf32>
      %c32_i32_40 = arith.constant 32 : i32
      %89 = arith.addi %c32_i32_40, %7 : i32
      %c10_i32 = arith.constant 10 : i32
      %90 = arith.subi %89, %c10_i32 : i32
      %91 = arith.index_cast %90 : i32 to index
      %c0_41 = arith.constant 0 : index
      %92 = vector.load %arg5[%91, %c0_41] : memref<64x128xf32, #tpu.memory_space<vmem>>, vector<16x128xf32>
      %c10 = arith.constant 10 : index
      %c0_42 = arith.constant 0 : index
      %93 = vector.load %arg3[%c10, %c0_42] : memref<32x128xf32, #tpu.memory_space<vmem>>, vector<1x128xf32>
      %94 = vector.broadcast %93 : vector<1x128xf32> to vector<16x128xf32>
      %95 = arith.mulf %92, %94 : vector<16x128xf32>
      %96 = arith.addf %88, %95 : vector<16x128xf32>
      %c32_i32_43 = arith.constant 32 : i32
      %97 = arith.addi %c32_i32_43, %7 : i32
      %c11_i32 = arith.constant 11 : i32
      %98 = arith.subi %97, %c11_i32 : i32
      %99 = arith.index_cast %98 : i32 to index
      %c0_44 = arith.constant 0 : index
      %100 = vector.load %arg5[%99, %c0_44] : memref<64x128xf32, #tpu.memory_space<vmem>>, vector<16x128xf32>
      %c11 = arith.constant 11 : index
      %c0_45 = arith.constant 0 : index
      %101 = vector.load %arg3[%c11, %c0_45] : memref<32x128xf32, #tpu.memory_space<vmem>>, vector<1x128xf32>
      %102 = vector.broadcast %101 : vector<1x128xf32> to vector<16x128xf32>
      %103 = arith.mulf %100, %102 : vector<16x128xf32>
      %104 = arith.addf %96, %103 : vector<16x128xf32>
      %c32_i32_46 = arith.constant 32 : i32
      %105 = arith.addi %c32_i32_46, %7 : i32
      %c12_i32 = arith.constant 12 : i32
      %106 = arith.subi %105, %c12_i32 : i32
      %107 = arith.index_cast %106 : i32 to index
      %c0_47 = arith.constant 0 : index
      %108 = vector.load %arg5[%107, %c0_47] : memref<64x128xf32, #tpu.memory_space<vmem>>, vector<16x128xf32>
      %c12 = arith.constant 12 : index
      %c0_48 = arith.constant 0 : index
      %109 = vector.load %arg3[%c12, %c0_48] : memref<32x128xf32, #tpu.memory_space<vmem>>, vector<1x128xf32>
      %110 = vector.broadcast %109 : vector<1x128xf32> to vector<16x128xf32>
      %111 = arith.mulf %108, %110 : vector<16x128xf32>
      %112 = arith.addf %104, %111 : vector<16x128xf32>
      %c32_i32_49 = arith.constant 32 : i32
      %113 = arith.addi %c32_i32_49, %7 : i32
      %c13_i32 = arith.constant 13 : i32
      %114 = arith.subi %113, %c13_i32 : i32
      %115 = arith.index_cast %114 : i32 to index
      %c0_50 = arith.constant 0 : index
      %116 = vector.load %arg5[%115, %c0_50] : memref<64x128xf32, #tpu.memory_space<vmem>>, vector<16x128xf32>
      %c13 = arith.constant 13 : index
      %c0_51 = arith.constant 0 : index
      %117 = vector.load %arg3[%c13, %c0_51] : memref<32x128xf32, #tpu.memory_space<vmem>>, vector<1x128xf32>
      %118 = vector.broadcast %117 : vector<1x128xf32> to vector<16x128xf32>
      %119 = arith.mulf %116, %118 : vector<16x128xf32>
      %120 = arith.addf %112, %119 : vector<16x128xf32>
      %c32_i32_52 = arith.constant 32 : i32
      %121 = arith.addi %c32_i32_52, %7 : i32
      %c14_i32 = arith.constant 14 : i32
      %122 = arith.subi %121, %c14_i32 : i32
      %123 = arith.index_cast %122 : i32 to index
      %c0_53 = arith.constant 0 : index
      %124 = vector.load %arg5[%123, %c0_53] : memref<64x128xf32, #tpu.memory_space<vmem>>, vector<16x128xf32>
      %c14 = arith.constant 14 : index
      %c0_54 = arith.constant 0 : index
      %125 = vector.load %arg3[%c14, %c0_54] : memref<32x128xf32, #tpu.memory_space<vmem>>, vector<1x128xf32>
      %126 = vector.broadcast %125 : vector<1x128xf32> to vector<16x128xf32>
      %127 = arith.mulf %124, %126 : vector<16x128xf32>
      %128 = arith.addf %120, %127 : vector<16x128xf32>
      %c32_i32_55 = arith.constant 32 : i32
      %129 = arith.addi %c32_i32_55, %7 : i32
      %c15_i32 = arith.constant 15 : i32
      %130 = arith.subi %129, %c15_i32 : i32
      %131 = arith.index_cast %130 : i32 to index
      %c0_56 = arith.constant 0 : index
      %132 = vector.load %arg5[%131, %c0_56] : memref<64x128xf32, #tpu.memory_space<vmem>>, vector<16x128xf32>
      %c15 = arith.constant 15 : index
      %c0_57 = arith.constant 0 : index
      %133 = vector.load %arg3[%c15, %c0_57] : memref<32x128xf32, #tpu.memory_space<vmem>>, vector<1x128xf32>
      %134 = vector.broadcast %133 : vector<1x128xf32> to vector<16x128xf32>
      %135 = arith.mulf %132, %134 : vector<16x128xf32>
      %136 = arith.addf %128, %135 : vector<16x128xf32>
      %c32_i32_58 = arith.constant 32 : i32
      %137 = arith.addi %c32_i32_58, %7 : i32
      %c16_i32_59 = arith.constant 16 : i32
      %138 = arith.subi %137, %c16_i32_59 : i32
      %139 = arith.index_cast %138 : i32 to index
      %c0_60 = arith.constant 0 : index
      %140 = vector.load %arg5[%139, %c0_60] : memref<64x128xf32, #tpu.memory_space<vmem>>, vector<16x128xf32>
      %c16 = arith.constant 16 : index
      %c0_61 = arith.constant 0 : index
      %141 = vector.load %arg3[%c16, %c0_61] : memref<32x128xf32, #tpu.memory_space<vmem>>, vector<1x128xf32>
      %142 = vector.broadcast %141 : vector<1x128xf32> to vector<16x128xf32>
      %143 = arith.mulf %140, %142 : vector<16x128xf32>
      %144 = arith.addf %136, %143 : vector<16x128xf32>
      %c32_i32_62 = arith.constant 32 : i32
      %145 = arith.addi %c32_i32_62, %7 : i32
      %c17_i32 = arith.constant 17 : i32
      %146 = arith.subi %145, %c17_i32 : i32
      %147 = arith.index_cast %146 : i32 to index
      %c0_63 = arith.constant 0 : index
      %148 = vector.load %arg5[%147, %c0_63] : memref<64x128xf32, #tpu.memory_space<vmem>>, vector<16x128xf32>
      %c17 = arith.constant 17 : index
      %c0_64 = arith.constant 0 : index
      %149 = vector.load %arg3[%c17, %c0_64] : memref<32x128xf32, #tpu.memory_space<vmem>>, vector<1x128xf32>
      %150 = vector.broadcast %149 : vector<1x128xf32> to vector<16x128xf32>
      %151 = arith.mulf %148, %150 : vector<16x128xf32>
      %152 = arith.addf %144, %151 : vector<16x128xf32>
      %c32_i32_65 = arith.constant 32 : i32
      %153 = arith.addi %c32_i32_65, %7 : i32
      %c18_i32 = arith.constant 18 : i32
      %154 = arith.subi %153, %c18_i32 : i32
      %155 = arith.index_cast %154 : i32 to index
      %c0_66 = arith.constant 0 : index
      %156 = vector.load %arg5[%155, %c0_66] : memref<64x128xf32, #tpu.memory_space<vmem>>, vector<16x128xf32>
      %c18 = arith.constant 18 : index
      %c0_67 = arith.constant 0 : index
      %157 = vector.load %arg3[%c18, %c0_67] : memref<32x128xf32, #tpu.memory_space<vmem>>, vector<1x128xf32>
      %158 = vector.broadcast %157 : vector<1x128xf32> to vector<16x128xf32>
      %159 = arith.mulf %156, %158 : vector<16x128xf32>
      %160 = arith.addf %152, %159 : vector<16x128xf32>
      %c32_i32_68 = arith.constant 32 : i32
      %161 = arith.addi %c32_i32_68, %7 : i32
      %c19_i32 = arith.constant 19 : i32
      %162 = arith.subi %161, %c19_i32 : i32
      %163 = arith.index_cast %162 : i32 to index
      %c0_69 = arith.constant 0 : index
      %164 = vector.load %arg5[%163, %c0_69] : memref<64x128xf32, #tpu.memory_space<vmem>>, vector<16x128xf32>
      %c19 = arith.constant 19 : index
      %c0_70 = arith.constant 0 : index
      %165 = vector.load %arg3[%c19, %c0_70] : memref<32x128xf32, #tpu.memory_space<vmem>>, vector<1x128xf32>
      %166 = vector.broadcast %165 : vector<1x128xf32> to vector<16x128xf32>
      %167 = arith.mulf %164, %166 : vector<16x128xf32>
      %168 = arith.addf %160, %167 : vector<16x128xf32>
      %c32_i32_71 = arith.constant 32 : i32
      %169 = arith.addi %c32_i32_71, %7 : i32
      %c20_i32 = arith.constant 20 : i32
      %170 = arith.subi %169, %c20_i32 : i32
      %171 = arith.index_cast %170 : i32 to index
      %c0_72 = arith.constant 0 : index
      %172 = vector.load %arg5[%171, %c0_72] : memref<64x128xf32, #tpu.memory_space<vmem>>, vector<16x128xf32>
      %c20 = arith.constant 20 : index
      %c0_73 = arith.constant 0 : index
      %173 = vector.load %arg3[%c20, %c0_73] : memref<32x128xf32, #tpu.memory_space<vmem>>, vector<1x128xf32>
      %174 = vector.broadcast %173 : vector<1x128xf32> to vector<16x128xf32>
      %175 = arith.mulf %172, %174 : vector<16x128xf32>
      %176 = arith.addf %168, %175 : vector<16x128xf32>
      %c32_i32_74 = arith.constant 32 : i32
      %177 = arith.addi %c32_i32_74, %7 : i32
      %c21_i32 = arith.constant 21 : i32
      %178 = arith.subi %177, %c21_i32 : i32
      %179 = arith.index_cast %178 : i32 to index
      %c0_75 = arith.constant 0 : index
      %180 = vector.load %arg5[%179, %c0_75] : memref<64x128xf32, #tpu.memory_space<vmem>>, vector<16x128xf32>
      %c21 = arith.constant 21 : index
      %c0_76 = arith.constant 0 : index
      %181 = vector.load %arg3[%c21, %c0_76] : memref<32x128xf32, #tpu.memory_space<vmem>>, vector<1x128xf32>
      %182 = vector.broadcast %181 : vector<1x128xf32> to vector<16x128xf32>
      %183 = arith.mulf %180, %182 : vector<16x128xf32>
      %184 = arith.addf %176, %183 : vector<16x128xf32>
      %c32_i32_77 = arith.constant 32 : i32
      %185 = arith.addi %c32_i32_77, %7 : i32
      %c22_i32 = arith.constant 22 : i32
      %186 = arith.subi %185, %c22_i32 : i32
      %187 = arith.index_cast %186 : i32 to index
      %c0_78 = arith.constant 0 : index
      %188 = vector.load %arg5[%187, %c0_78] : memref<64x128xf32, #tpu.memory_space<vmem>>, vector<16x128xf32>
      %c22 = arith.constant 22 : index
      %c0_79 = arith.constant 0 : index
      %189 = vector.load %arg3[%c22, %c0_79] : memref<32x128xf32, #tpu.memory_space<vmem>>, vector<1x128xf32>
      %190 = vector.broadcast %189 : vector<1x128xf32> to vector<16x128xf32>
      %191 = arith.mulf %188, %190 : vector<16x128xf32>
      %192 = arith.addf %184, %191 : vector<16x128xf32>
      %c32_i32_80 = arith.constant 32 : i32
      %193 = arith.addi %c32_i32_80, %7 : i32
      %c23_i32 = arith.constant 23 : i32
      %194 = arith.subi %193, %c23_i32 : i32
      %195 = arith.index_cast %194 : i32 to index
      %c0_81 = arith.constant 0 : index
      %196 = vector.load %arg5[%195, %c0_81] : memref<64x128xf32, #tpu.memory_space<vmem>>, vector<16x128xf32>
      %c23 = arith.constant 23 : index
      %c0_82 = arith.constant 0 : index
      %197 = vector.load %arg3[%c23, %c0_82] : memref<32x128xf32, #tpu.memory_space<vmem>>, vector<1x128xf32>
      %198 = vector.broadcast %197 : vector<1x128xf32> to vector<16x128xf32>
      %199 = arith.mulf %196, %198 : vector<16x128xf32>
      %200 = arith.addf %192, %199 : vector<16x128xf32>
      %c32_i32_83 = arith.constant 32 : i32
      %201 = arith.addi %c32_i32_83, %7 : i32
      %c24_i32 = arith.constant 24 : i32
      %202 = arith.subi %201, %c24_i32 : i32
      %203 = arith.index_cast %202 : i32 to index
      %c0_84 = arith.constant 0 : index
      %204 = vector.load %arg5[%203, %c0_84] : memref<64x128xf32, #tpu.memory_space<vmem>>, vector<16x128xf32>
      %c24 = arith.constant 24 : index
      %c0_85 = arith.constant 0 : index
      %205 = vector.load %arg3[%c24, %c0_85] : memref<32x128xf32, #tpu.memory_space<vmem>>, vector<1x128xf32>
      %206 = vector.broadcast %205 : vector<1x128xf32> to vector<16x128xf32>
      %207 = arith.mulf %204, %206 : vector<16x128xf32>
      %208 = arith.addf %200, %207 : vector<16x128xf32>
      %c32_i32_86 = arith.constant 32 : i32
      %209 = arith.addi %c32_i32_86, %7 : i32
      %c25_i32 = arith.constant 25 : i32
      %210 = arith.subi %209, %c25_i32 : i32
      %211 = arith.index_cast %210 : i32 to index
      %c0_87 = arith.constant 0 : index
      %212 = vector.load %arg5[%211, %c0_87] : memref<64x128xf32, #tpu.memory_space<vmem>>, vector<16x128xf32>
      %c25 = arith.constant 25 : index
      %c0_88 = arith.constant 0 : index
      %213 = vector.load %arg3[%c25, %c0_88] : memref<32x128xf32, #tpu.memory_space<vmem>>, vector<1x128xf32>
      %214 = vector.broadcast %213 : vector<1x128xf32> to vector<16x128xf32>
      %215 = arith.mulf %212, %214 : vector<16x128xf32>
      %216 = arith.addf %208, %215 : vector<16x128xf32>
      %c32_i32_89 = arith.constant 32 : i32
      %217 = arith.addi %c32_i32_89, %7 : i32
      %c26_i32 = arith.constant 26 : i32
      %218 = arith.subi %217, %c26_i32 : i32
      %219 = arith.index_cast %218 : i32 to index
      %c0_90 = arith.constant 0 : index
      %220 = vector.load %arg5[%219, %c0_90] : memref<64x128xf32, #tpu.memory_space<vmem>>, vector<16x128xf32>
      %c26 = arith.constant 26 : index
      %c0_91 = arith.constant 0 : index
      %221 = vector.load %arg3[%c26, %c0_91] : memref<32x128xf32, #tpu.memory_space<vmem>>, vector<1x128xf32>
      %222 = vector.broadcast %221 : vector<1x128xf32> to vector<16x128xf32>
      %223 = arith.mulf %220, %222 : vector<16x128xf32>
      %224 = arith.addf %216, %223 : vector<16x128xf32>
      %c32_i32_92 = arith.constant 32 : i32
      %225 = arith.addi %c32_i32_92, %7 : i32
      %c27_i32 = arith.constant 27 : i32
      %226 = arith.subi %225, %c27_i32 : i32
      %227 = arith.index_cast %226 : i32 to index
      %c0_93 = arith.constant 0 : index
      %228 = vector.load %arg5[%227, %c0_93] : memref<64x128xf32, #tpu.memory_space<vmem>>, vector<16x128xf32>
      %c27 = arith.constant 27 : index
      %c0_94 = arith.constant 0 : index
      %229 = vector.load %arg3[%c27, %c0_94] : memref<32x128xf32, #tpu.memory_space<vmem>>, vector<1x128xf32>
      %230 = vector.broadcast %229 : vector<1x128xf32> to vector<16x128xf32>
      %231 = arith.mulf %228, %230 : vector<16x128xf32>
      %232 = arith.addf %224, %231 : vector<16x128xf32>
      %c32_i32_95 = arith.constant 32 : i32
      %233 = arith.addi %c32_i32_95, %7 : i32
      %c28_i32 = arith.constant 28 : i32
      %234 = arith.subi %233, %c28_i32 : i32
      %235 = arith.index_cast %234 : i32 to index
      %c0_96 = arith.constant 0 : index
      %236 = vector.load %arg5[%235, %c0_96] : memref<64x128xf32, #tpu.memory_space<vmem>>, vector<16x128xf32>
      %c28 = arith.constant 28 : index
      %c0_97 = arith.constant 0 : index
      %237 = vector.load %arg3[%c28, %c0_97] : memref<32x128xf32, #tpu.memory_space<vmem>>, vector<1x128xf32>
      %238 = vector.broadcast %237 : vector<1x128xf32> to vector<16x128xf32>
      %239 = arith.mulf %236, %238 : vector<16x128xf32>
      %240 = arith.addf %232, %239 : vector<16x128xf32>
      %c32_i32_98 = arith.constant 32 : i32
      %241 = arith.addi %c32_i32_98, %7 : i32
      %c29_i32 = arith.constant 29 : i32
      %242 = arith.subi %241, %c29_i32 : i32
      %243 = arith.index_cast %242 : i32 to index
      %c0_99 = arith.constant 0 : index
      %244 = vector.load %arg5[%243, %c0_99] : memref<64x128xf32, #tpu.memory_space<vmem>>, vector<16x128xf32>
      %c29 = arith.constant 29 : index
      %c0_100 = arith.constant 0 : index
      %245 = vector.load %arg3[%c29, %c0_100] : memref<32x128xf32, #tpu.memory_space<vmem>>, vector<1x128xf32>
      %246 = vector.broadcast %245 : vector<1x128xf32> to vector<16x128xf32>
      %247 = arith.mulf %244, %246 : vector<16x128xf32>
      %248 = arith.addf %240, %247 : vector<16x128xf32>
      %c32_i32_101 = arith.constant 32 : i32
      %249 = arith.addi %c32_i32_101, %7 : i32
      %c30_i32 = arith.constant 30 : i32
      %250 = arith.subi %249, %c30_i32 : i32
      %251 = arith.index_cast %250 : i32 to index
      %c0_102 = arith.constant 0 : index
      %252 = vector.load %arg5[%251, %c0_102] : memref<64x128xf32, #tpu.memory_space<vmem>>, vector<16x128xf32>
      %c30 = arith.constant 30 : index
      %c0_103 = arith.constant 0 : index
      %253 = vector.load %arg3[%c30, %c0_103] : memref<32x128xf32, #tpu.memory_space<vmem>>, vector<1x128xf32>
      %254 = vector.broadcast %253 : vector<1x128xf32> to vector<16x128xf32>
      %255 = arith.mulf %252, %254 : vector<16x128xf32>
      %256 = arith.addf %248, %255 : vector<16x128xf32>
      %c32_i32_104 = arith.constant 32 : i32
      %257 = arith.addi %c32_i32_104, %7 : i32
      %c31_i32 = arith.constant 31 : i32
      %258 = arith.subi %257, %c31_i32 : i32
      %259 = arith.index_cast %258 : i32 to index
      %c0_105 = arith.constant 0 : index
      %260 = vector.load %arg5[%259, %c0_105] : memref<64x128xf32, #tpu.memory_space<vmem>>, vector<16x128xf32>
      %c31 = arith.constant 31 : index
      %c0_106 = arith.constant 0 : index
      %261 = vector.load %arg3[%c31, %c0_106] : memref<32x128xf32, #tpu.memory_space<vmem>>, vector<1x128xf32>
      %262 = vector.broadcast %261 : vector<1x128xf32> to vector<16x128xf32>
      %263 = arith.mulf %260, %262 : vector<16x128xf32>
      %264 = arith.addf %256, %263 : vector<16x128xf32>
      %c32_i32_107 = arith.constant 32 : i32
      %265 = arith.addi %c32_i32_107, %7 : i32
      %266 = tpu.assume_multiple %265, 8 : i32
      %267 = arith.index_cast %266 : i32 to index
      %c0_108 = arith.constant 0 : index
      %268 = vector.load %arg5[%267, %c0_108] : memref<64x128xf32, #tpu.memory_space<vmem>>, vector<16x128xf32>
      %269 = arith.addf %264, %268 : vector<16x128xf32>
      %c0_109 = arith.constant 0 : index
      %270 = arith.index_cast %7 : i32 to index
      %c0_110 = arith.constant 0 : index
      %271 = vector.load %arg4[%c0_109, %270, %c0_110] : memref<1x32x128xf32, #tpu.memory_space<vmem>>, vector<1x16x128xf32>
      %272 = vector.shape_cast %271 : vector<1x16x128xf32> to vector<16x128xf32>
      %273 = vector.shape_cast %269 : vector<16x128xf32> to vector<1x16x128xf32>
      tpu.vector_store %arg4[%c0_109, %270, %c0_110], %273 {strides = array<i32>} : memref<1x32x128xf32, #tpu.memory_space<vmem>>, vector<1x16x128xf32>,
    }
    %c2_i32_5 = arith.constant 2 : i32
    return
  }
  func.func @transform_0(%arg0: i32, %arg1: i32) -> (i32, i32, i32) {
    %c0_i32 = arith.constant 0 : i32
    %c0_i32_0 = arith.constant 0 : i32
    return %arg1, %c0_i32, %arg0 : i32, i32, i32
  }
  func.func @transform_1(%arg0: i32, %arg1: i32) -> (i32, i32) {
    %c0_i32 = arith.constant 0 : i32
    %c0_i32_0 = arith.constant 0 : i32
    return %c0_i32, %arg0 : i32, i32
  }
  func.func @transform_2(%arg0: i32, %arg1: i32) -> (i32, i32, i32) {
    %c0_i32 = arith.constant 0 : i32
    %c0_i32_0 = arith.constant 0 : i32
    return %arg1, %c0_i32, %arg0 : i32, i32, i32
  }
}

</mosaic_0001>

<bundles_post_ra>
// kernel: tpu_custom_call.1
= control target key start
LH: loop header
LB: loop body
LE: loop exit
PB: predicated region body
PF: predicated region fallthrough
CT: control target
= control target key end

     0   :  { %s1619_s0 = inlined_call_operand.hbm [shape: f32[2,32,256], index: 0, kind: input, shape index: {}]   ;;  %s1620_s1 = inlined_call_operand.hbm [shape: f32[32,256], index: 1, kind: input, shape index: {}]   ;;  %s1621_s2 = inlined_call_operand.hbm [shape: f32[2,32,256], index: 2, kind: output, shape index: {}]  }
   0x1   :  { %1627 = sst [smem:[#allocation16_spill]] %s1619_s0 }
   0x2   :  { %7 = vsyncpa [#allocation4], 0 }
   0x3   :  { %9 = vsyncpa [#allocation4 + $0x1], 0 }
   0x4   :  { %10 = vsyncpa [#allocation7], 0 }
   0x5   :  { %12 = vsyncpa [#allocation7 + $0x1], 0 }
   0x6   :  { %13 = vsyncpa [#allocation5], 0 }
   0x7   :  { %15 = vsyncpa [#allocation5 + $0x1], 0  ;;  %s1293_s9 = smov 0   ;;  %s1295_s10 = smov 0  }
   0x8   :  { %s1297_s11 = smov 0   ;;  %s1299_s12 = smov 0  }
   0x9   :  { %s1301_s13 = smov 0   ;;  %s1303_s14 = smov 0  }
   0xa   :  { %s1305_s15 = smov 0   ;;  %s1307_s16 = smov 0  }
   0xb   :  { %s1309_s17 = smov 0   ;;  %s1311_s18 = smov 0  }
   0xc   :  { %s1313_s19 = smov 0  }
   0xd LB: > { %1628 = sst [smem:[#allocation12_spill]] %s1257_s17  ;;  %s803_s20 = sadd.s32 4294967295, %s1265_s19   ;;  %s1265_s19 = sphi %s1313_s19, %s21_s19   ;;  %s1261_s18 = sphi %s1311_s18, %s1652_s18   ;;  %s1257_s17 = sphi %s1309_s17, %s1643_s17   ;;  %s1253_s16 = sphi %s1307_s16, %s1651_s16   ;;  %s1249_s15 = sphi %s1305_s15, %s1642_s15   ;;  %s1245_s14 = sphi %s1303_s14, %s1650_s14   ;;  %s1241_s13 = sphi %s1301_s13, %s1649_s13   ;;  %s1237_s12 = sphi %s1299_s12, %s1648_s12   ;;  %s1233_s11 = sphi %s1297_s11, %s1647_s11   ;;  %s1229_s10 = sphi %s1295_s10, %s1646_s10   ;;  %s1225_s9 = sphi %s1293_s9, %s1645_s9  }
   0xe   : > { %s804_s21 = sadd.s32 4294967294, %s1265_s19   ;;  %s30_s22 = sadd.s32 1, %s1257_s17 }
   0xf   : > { %s33_s23 = sadd.s32 1, %s1261_s18  ;;  %p31_p0 = scmp.ge.s32.totalorder %s30_s22, 2 }
  0x10   : > { %s42_s24 = sadd.s32 1, %s1245_s14  ;;  %p49_p1 = scmp.ne.s32.totalorder %s1245_s14, %s1241_s13 }
  0x11   : > { %p50_p2 = scmp.eq.s32.totalorder %s1265_s19, 0  ;;  %s1654_s22 = smov (%p31_p0, %s30_s22), 0 }
  0x12   : > { %1629 = sst [smem:[#allocation13_spill]] %s1654_s22  ;;  %s1656_s23 = smov (!%p31_p0, %s33_s23), %s1261_s18 }
  0x13   : > { %s37_s25 = ssub.s32 %s1257_s17, %s1654_s22  ;;  %p1363_p3 = por %p50_p2, %p49_p1 }
  0x14   : > { %p35_p4 = scmp.ge.s32.totalorder %s1656_s23, 2  ;;  %p55_p5 = scmp.ne.s32.totalorder %s1241_s13, %s1237_s12 }
  0x15   : > { %p1369_p6 = scmp.eq.s32.totalorder %s803_s20, 0  ;;  %p107_p7 = scmp.eq.s32.totalorder %s803_s20, 3 }
  0x16   : > { %s1658_s23 = smov (%p35_p4, %s1656_s23), 0  ;;  %p113_p10 = scmp.eq.s32.totalorder %s804_s21, 3 }
  0x17   : > { %1632 = sst [smem:[#allocation14_spill]] %s1658_s23  ;;  %p1377_p8 = por %p1369_p6, %p55_p5 }
  0x18   : > { %p1381_p9 = por %p107_p7, %p49_p1  ;;  %s1387_s30 = ssub.s32 %s1261_s18, %s1658_s23 }
  0x19   : > { %s39_s3 = sor.u32 %s1387_s30, %s37_s25  ;;  %p66_p11 = scmp.eq.s32.totalorder %s1387_s30, 0 }
  0x1a   : > { %p40_p12 = scmp.eq.s32.totalorder %s39_s3, 0  ;;  %p1391_p13 = por %p113_p10, %p55_p5 }
  0x1b   : > { %p1625_p0 = scmp.lt.s32.totalorder %s1265_s19, 4  ;;  %s133_s6 = sand.u32 1, %s1245_s14  }
  0x1c   : > { %s1635_s4 = scalar_select %p1391_p13, 1, 0 }
  0x1d   : > { %s1397_s5 = scalar_select %p40_p12, %s1245_s14, %s42_s24  }
  0x1e   : > { %1636 = sst [smem:[#allocation15_spill]] %s1635_s4  ;;  %s808_s7 = sshll.u32 %s1257_s17, 3 }
  0x1f   : > { %s807_s8 = sshll.u32 %s133_s6, 5  ;;  %s141_s20 = sadd.s32 %s1261_s18, %s808_s7 }
  0x20   : > { %s809_s23 = sshll.u32 %s141_s20, 3  ;;  %s137_s21 = scalar_lea.vmem [#allocation3], %s807_s8 }
  0x21   : > { %s146_s25 = sshll.u32 %s137_s21, 4  ;;  %s1637_s0 = sld [smem:[#allocation16_spill]]  ;;  %s147_s25 = int_to_ptr.vmem [resolvable:$true] %s146_s25 }
  0x22   : > { %p928_p1 = pnand %p1625_p0, %p1363_p3  ;;  %p812_p4 = scmp.ge.s32.totalorder %s1265_s19, 1 }
  0x23   : > { %s134_s7 = scalar_lea.sflag [#allocation4], %s133_s6  ;;  %s1271_s8 = smov 256  }
  0x24   : > { %s1272_s20 = smov 128   ;;  %s1273_s22 = smov 8  }
  0x25   : > { %p175_p5 = scmp.lt.s32.totalorder %s1265_s19, 5  ;;  %p75_p10 = scmp.ne.s32.totalorder %s1233_s11, %s1229_s10 }
  0x26   : > { %p81_p12 = scmp.ne.s32.totalorder %s1229_s10, %s1225_s9  ;;  %s156_s21 = sand.u32 1, %s1233_s11  }
  0x27   : > { %s143_s4 = scalar_lea.hbm %s1637_s0, %s809_s23  ;;  %p1411_p7 = pnand %p812_p4, %p175_p5 }
  0x28   : > { %s144_s24 = sshll.u32 %s143_s4, 4  ;;  %s68_s4 = sadd.s32 1, %s1233_s11  ;;  %s145_s24 = int_to_ptr.hbm [resolvable:$true] %s144_s24 }
  0x29   : > { %930 = dma.hbm_to_vmem [thread:$0]  (!%p928_p1), %s145_s24, 512, %s147_s25, %s134_s7, %s1271_s8, %s1272_s20, %s1273_s22  }
  0x2a   : > { %s1421_s26 = scalar_select %p66_p11, %s1233_s11, %s68_s4  }
  0x2b   : > { %p77_p3 = por %p75_p10, %p50_p2  ;;  %s811_s6 = sshll.u32 %s1261_s18, 3 }
  0x2c   : > { %p1431_p0 = por %p81_p12, %p1369_p6  ;;  %s810_s25 = sshll.u32 %s156_s21, 5 }
  0x2d   : > { %s164_s0 = scalar_lea.hbm %s1620_s1, %s811_s6  ;;  %s160_s30 = scalar_lea.vmem [#allocation6], %s810_s25 }
  0x2e   : > { %s165_s17 = sshll.u32 %s164_s0, 4  ;;  %s167_s4 = sshll.u32 %s160_s30, 4  ;;  %s166_s17 = int_to_ptr.hbm [resolvable:$true] %s165_s17  ;;  %s168_s4 = int_to_ptr.vmem [resolvable:$true] %s167_s4 }
  0x2f   : > { %p1640_p11 = scmp.lt.s32.totalorder %s1265_s19, 4  ;;  %s157_s9 = scalar_lea.sflag [#allocation7], %s156_s21 }
  0x30   : > { %179 = sbr.rel (%p1411_p7) target bundleno = 147 (0x93), region = 28  ;;  %s1443_s27 = sand.u32 (!%p1411_p7), 1, %s1241_s13  }
  0x31   : > { %p931_p2 = pnand %p1640_p11, %p77_p3  ;;  %s813_s24 = sshll.u32 (!%p1411_p7), %s1443_s27, 5 }
  0x32   : > { %s182_s6 = scalar_lea.sflag (!%p1411_p7), [#allocation4], %s1443_s27  ;;  %s185_s0 = scalar_lea.vmem (!%p1411_p7), [#allocation3], %s813_s24 }
  0x33   : > { %933 = dma.hbm_to_vmem [thread:$0]  (!%p931_p2), %s166_s17, 512, %s168_s4, %s157_s9, %s1271_s8, %s1272_s20, %s1273_s22  }
  0x35   : > { %1212 = dma.done.wait (%p1377_p8), %s182_s6, 512  }
  0x36   : > { %1214 = vsyncadd (%p1377_p8), %s182_s6, 4294966784  ;;  %s191_s17 = sand.u32 1, %s1229_s10  }
  0x37   : > { %s814_s8 = sshll.u32 %s191_s17, 5  ;;  %s192_s20 = scalar_lea.sflag [#allocation7], %s191_s17 }
  0x38   : > { %s1452_s22 = scalar_lea.vmem [#allocation6], %s814_s8 }
  0x39   : > { %1216 = dma.done.wait (%p1431_p0), %s192_s20, 512  }
  0x3a   : > { %1218 = vsyncadd (%p1431_p0), %s192_s20, 4294966784  ;;  %v1274_v0 = vmov 0.0   ;;  %v226_v1 = vld [vmem:[%s185_s0] sm:$0xff]  ;;  %v227_v2 = vld [vmem:[%s185_s0 + $0x8] sm:$0xff]  ;;  %s1458_s28 = scalar_lea.vmem [#allocation8], %s813_s24  ;;  %s1460_s23 = smov 0  }
  0x3b   : > { %222 = vst [vmem:[#allocation2] sm:$0xff] %v1274_v0  ;;  %v228_v3 = vld [vmem:[%s185_s0 + $0x10] sm:$0xff]  ;;  %v229_v4 = vld [vmem:[%s185_s0 + $0x18] sm:$0xff] }
  0x3c   : > { %223 = vst [vmem:[#allocation2 + $0x8] sm:$0xff] %v1274_v0 }
  0x3d   : > { %224 = vst [vmem:[#allocation2 + $0x10] sm:$0xff] %v1274_v0 }
  0x3e   : > { %225 = vst [vmem:[#allocation2 + $0x18] sm:$0xff] %v1274_v0 }
  0x3f   : > { %230 = vst [vmem:[#allocation2 + $0x20] sm:$0xff] %v226_v1 }
  0x40   : > { %231 = vst [vmem:[#allocation2 + $0x28] sm:$0xff] %v227_v2 }
  0x41   : > { %232 = vst [vmem:[#allocation2 + $0x30] sm:$0xff] %v228_v3 }
  0x42   : > { %233 = vst [vmem:[#allocation2 + $0x38] sm:$0xff] %v229_v4 }
  0x43 LB: >> { %v1043_v5 = vld [vmem:[%s1452_s22] ss:$0 sm:$0xff]  ;;  %v1044_v6 = vld [vmem:[%s1452_s22 + $0x1] ss:$0 sm:$0xff]  ;;  %v1045_v7 = vld [vmem:[%s1452_s22 + $0x2] ss:$0 sm:$0xff]  ;;  %s1269_s23 = sphi %s1460_s23, %s239_s23  }
  0x44   : >> { %s816_s21 = sshll.u32 %s1269_s23, 4  ;;  %v1046_v8 = vld [vmem:[%s1452_s22 + $0x3] ss:$0 sm:$0xff]  ;;  %v1047_v9 = vld [vmem:[%s1452_s22 + $0x4] ss:$0 sm:$0xff]  ;;  %s239_s23 = sadd.s32 1, %s1269_s23  }
  0x45   : >> { %s1473_s3 = scalar_lea.vmem [#allocation2], %s816_s21  ;;  %v1048_v31 = vld [vmem:[%s1452_s22 + $0x5] ss:$0 sm:$0xff]  ;;  %v1049_v35 = vld [vmem:[%s1452_s22 + $0x6] ss:$0 sm:$0xff]  ;;  %s566_s25 = scalar_lea.vmem %s1458_s28, %s816_s21 [#allocation8] }
  0x46   : >> { %v1050_v42 = vld [vmem:[%s1452_s22 + $0x7] ss:$0 sm:$0xff]  ;;  %v1051_v49 = vld [vmem:[%s1452_s22 + $0x8] ss:$0 sm:$0xff]  ;;  %v1052_v55 = vld [vmem:[%s1452_s22 + $0x9] ss:$0 sm:$0xff] }
  0x47   : >> { %v1053_v61 = vld [vmem:[%s1452_s22 + $0xa] ss:$0 sm:$0xff]  ;;  %v1054_v3 = vld [vmem:[%s1452_s22 + $0xb] ss:$0 sm:$0xff]  ;;  %p236_p6 = scmp.ge.s32.totalorder %s239_s23, 2  }
  0x48   : > { %s917_s7 = sshll.u32 (%p236_p6), %s1249_s15, 3  ;;  %s583_s4 = sshll.u32 (%p236_p6), %s1458_s28, 4  ;;  %s584_s4 = int_to_ptr.vmem [resolvable:$true] %s583_s4 }
  0x49   : >> { %v1476_v10 = vld [vmem:[%s1473_s3 + $0x20] sm:$0xff]  ;;  %v1479_v11 = vld [vmem:[%s1473_s3 + $0x28] sm:$0xff]  ;;  %v842_v52 = vld [vmem:[%s1473_s3 + $0x18] sm:$0xff]  ;;  %s580_s30 = sadd.s32 (%p236_p6), %s1253_s16, %s917_s7  ;;  %s570_s8 = scalar_lea.sflag (%p236_p6), [#allocation5], %s1443_s27 }
  0x4a   : >> { %v821_v12 = vld [vmem:[%s1473_s3 + $0x1f] sm:$0xff]  ;;  %v247_v13 = vmul.f32 %v1043_v5, %v1476_v10  ;;  %v248_v14 = vmul.f32 %v1043_v5, %v1479_v11  ;;  %v822_v15 = vld [vmem:[%s1473_s3 + $0x27] sm:$0xff]  ;;  %v845_v58 = vld [vmem:[%s1473_s3 + $0x17] sm:$0xff]  ;;  %v327_v60 = vmul.f32 %v1051_v49, %v842_v52  ;;  %v328_v63 = vmul.f32 %v1051_v49, %v1476_v10  ;;  %s918_s9 = sshll.u32 (%p236_p6), %s580_s30, 3  ;;  %s1155_s16 = scalar_lea.hbm (%p236_p6), %s1621_s2, 128 }
  0x4b   : >> { %v257_v16 = vmul.f32 %v1044_v6, %v821_v12  ;;  %v824_v17 = vld [vmem:[%s1473_s3 + $0x1e] sm:$0xff]  ;;  %v825_v18 = vld [vmem:[%s1473_s3 + $0x26] sm:$0xff]  ;;  %v258_v19 = vmul.f32 %v1044_v6, %v822_v15  ;;  %v848_v0 = vld [vmem:[%s1473_s3 + $0x16] sm:$0xff]  ;;  %v337_v2 = vmul.f32 %v1052_v55, %v845_v58  ;;  %v338_v5 = vmul.f32 %v1052_v55, %v821_v12  ;;  %s582_s0 = scalar_lea.hbm (%p236_p6), %s1621_s2, %s918_s9 }
  0x4c   : >> { %v267_v20 = vmul.f32 %v1045_v7, %v824_v17  ;;  %v268_v21 = vmul.f32 %v1045_v7, %v825_v18  ;;  %v827_v22 = vld [vmem:[%s1473_s3 + $0x1d] sm:$0xff]  ;;  %v828_v23 = vld [vmem:[%s1473_s3 + $0x25] sm:$0xff]  ;;  %v851_v6 = vld [vmem:[%s1473_s3 + $0x15] sm:$0xff]  ;;  %s585_s17 = sshll.u32 (%p236_p6), %s582_s0, 4  ;;  %s586_s17 = int_to_ptr.hbm [resolvable:$true] %s585_s17 }
  0x4d   : >> { %v1490_v24 = vld [vmem:[%s1473_s3 + $0x1c] sm:$0xff]  ;;  %v259_v25 = vadd.f32 %v257_v16, %v247_v13  ;;  %v277_v26 = vmul.f32 %v1046_v8, %v827_v22  ;;  %v831_v27 = vld [vmem:[%s1473_s3 + $0x24] sm:$0xff]  ;;  %v260_v28 = vadd.f32 %v258_v19, %v248_v14  ;;  %v278_v29 = vmul.f32 %v1046_v8, %v828_v23  ;;  %v854_v15 = vld [vmem:[%s1473_s3 + $0x14] sm:$0xff]  ;;  %s1149_s20 = sshra.s32 (%p236_p6), %s586_s17, 4  ;;  %s1150_s20 = int_to_ptr.hbm [resolvable:$true] %s1149_s20 }
  0x4e   : >> { %v1494_v30 = vld [vmem:[%s1473_s3 + $0x1b] sm:$0xff]  ;;  %v287_v33 = vmul.f32 %v1047_v9, %v1490_v24  ;;  %v834_v34 = vld [vmem:[%s1473_s3 + $0x23] sm:$0xff]  ;;  %v288_v37 = vmul.f32 %v1047_v9, %v831_v27  ;;  %v347_v8 = vmul.f32 %v1053_v61, %v848_v0  ;;  %v1055_v9 = vld [vmem:[%s1452_s22 + $0xc] ss:$0 sm:$0xff]  ;;  %v348_v14 = vmul.f32 %v1053_v61, %v824_v17  ;;  %s1151_s23 = scalar_lea.hbm (%p236_p6), %s1150_s20, 32  ;;  %p1156_p4 = scmp.lt.s32.totalorder (%p236_p6), %s1150_s20, %s1621_s2 }
  0x4f   : >> { %v269_v32 = vadd.f32 %v267_v20, %v259_v25  ;;  %v270_v36 = vadd.f32 %v268_v21, %v260_v28  ;;  %v836_v38 = vld [vmem:[%s1473_s3 + $0x1a] sm:$0xff]  ;;  %v297_v40 = vmul.f32 %v1048_v31, %v1494_v30  ;;  %v837_v41 = vld [vmem:[%s1473_s3 + $0x22] sm:$0xff]  ;;  %v298_v44 = vmul.f32 %v1048_v31, %v834_v34  ;;  %v1056_v19 = vld [vmem:[%s1452_s22 + $0xd] ss:$0 sm:$0xff]  ;;  %p1152_p8 = scmp.ne.s32.totalorder (%p236_p6), %s1150_s20, %s1151_s23  ;;  %p1157_p5 = scmp.lt.s32.totalorder (%p236_p6), %s1155_s16, %s1151_s23 }
  0x50   : >> { %v839_v45 = vld [vmem:[%s1473_s3 + $0x19] sm:$0xff]  ;;  %v307_v47 = vmul.f32 %v1049_v35, %v836_v38  ;;  %v840_v48 = vld [vmem:[%s1473_s3 + $0x21] sm:$0xff]  ;;  %v308_v51 = vmul.f32 %v1049_v35, %v837_v41  ;;  %v357_v18 = vmul.f32 %v1054_v3, %v851_v6  ;;  %v358_v21 = vmul.f32 %v1054_v3, %v827_v22  ;;  %v863_v22 = vld [vmem:[%s1473_s3 + $0x11] sm:$0xff] }
  0x51   : >> { %v279_v39 = vadd.f32 %v277_v26, %v269_v32  ;;  %v280_v43 = vadd.f32 %v278_v29, %v270_v36  ;;  %v317_v54 = vmul.f32 %v1050_v42, %v839_v45  ;;  %v318_v57 = vmul.f32 %v1050_v42, %v840_v48  ;;  %v857_v23 = vld [vmem:[%s1473_s3 + $0x13] sm:$0xff]  ;;  %v1057_v26 = vld [vmem:[%s1452_s22 + $0xe] ss:$0 sm:$0xff]  ;;  %v1058_v32 = vld [vmem:[%s1452_s22 + $0xf] ss:$0 sm:$0xff]  ;;  %p1153_p0 = pnand (%p236_p6), %p1152_p8, %p1381_p9  ;;  %p1158_p7 = por (%p236_p6), %p1157_p5, %p1156_p4 }
  0x52   : >> { %v367_v12 = vmul.f32 %v1055_v9, %v854_v15  ;;  %v368_v28 = vmul.f32 %v1055_v9, %v1490_v24  ;;  %v860_v29 = vld [vmem:[%s1473_s3 + $0x12] sm:$0xff]  ;;  %v377_v31 = vmul.f32 %v1056_v19, %v857_v23  ;;  %v378_v34 = vmul.f32 %v1056_v19, %v1494_v30 }
  0x53   : >> { %v289_v46 = vadd.f32 %v287_v33, %v279_v39  ;;  %v290_v50 = vadd.f32 %v288_v37, %v280_v43  ;;  %v387_v36 = vmul.f32 %v1057_v26, %v860_v29  ;;  %v1059_v37 = vld [vmem:[%s1452_s22 + $0x10] ss:$0 sm:$0xff]  ;;  %v397_v42 = vmul.f32 %v1058_v32, %v863_v22  ;;  %v1060_v43 = vld [vmem:[%s1452_s22 + $0x11] ss:$0 sm:$0xff]  ;;  %v1061_v49 = vld [vmem:[%s1452_s22 + $0x12] ss:$0 sm:$0xff]  ;;  %p1154_p1 = pneg (%p236_p6), %p1153_p0 }
  0x54   : >> { %v866_v41 = vld [vmem:[%s1473_s3 + $0x10] sm:$0xff] }
  0x55   : >> { %v299_v53 = vadd.f32 %v297_v40, %v289_v46  ;;  %v300_v56 = vadd.f32 %v298_v44, %v290_v50  ;;  %v388_v40 = vmul.f32 %v1057_v26, %v836_v38  ;;  %v398_v46 = vmul.f32 %v1058_v32, %v839_v45  ;;  %v1062_v55 = vld [vmem:[%s1452_s22 + $0x13] ss:$0 sm:$0xff]  ;;  %v1063_v61 = vld [vmem:[%s1452_s22 + $0x14] ss:$0 sm:$0xff]  ;;  %v1064_v3 = vld [vmem:[%s1452_s22 + $0x15] ss:$0 sm:$0xff]  ;;  %p1159_p10 = pnand (%p236_p6), %p1158_p7, %p1154_p1 }
  0x56   : >> { %v407_v30 = vmul.f32 %v1059_v37, %v866_v41  ;;  %v1065_v9 = vld [vmem:[%s1452_s22 + $0x16] ss:$0 sm:$0xff]  ;;  %v1066_v19 = vld [vmem:[%s1452_s22 + $0x17] ss:$0 sm:$0xff]  ;;  %v1067_v26 = vld [vmem:[%s1452_s22 + $0x18] ss:$0 sm:$0xff] }
  0x57   : >> { %v309_v59 = vadd.f32 %v307_v47, %v299_v53  ;;  %v310_v62 = vadd.f32 %v308_v51, %v300_v56  ;;  %v869_v47 = vld [vmem:[%s1473_s3 + $0xf] sm:$0xff]  ;;  %v408_v51 = vmul.f32 %v1059_v37, %v842_v52  ;;  %v1068_v32 = vld [vmem:[%s1452_s22 + $0x19] ss:$0 sm:$0xff]  ;;  %v1069_v37 = vld [vmem:[%s1452_s22 + $0x1a] ss:$0 sm:$0xff] }
  0x58   : >> { %v872_v53 = vld [vmem:[%s1473_s3 + $0xe] sm:$0xff]  ;;  %v417_v38 = vmul.f32 %v1060_v43, %v869_v47 }
  0x59   : >> { %v319_v1 = vadd.f32 %v317_v54, %v309_v59  ;;  %v320_v4 = vadd.f32 %v318_v57, %v310_v62  ;;  %v418_v57 = vmul.f32 %v1060_v43, %v845_v58  ;;  %v875_v59 = vld [vmem:[%s1473_s3 + $0xd] sm:$0xff]  ;;  %v427_v45 = vmul.f32 %v1061_v49, %v872_v53  ;;  %v1070_v43 = vld [vmem:[%s1452_s22 + $0x1b] ss:$0 sm:$0xff] }
  0x5a   : >> { %v437_v52 = vmul.f32 %v1062_v55, %v875_v59 }
  0x5b   : >> { %v329_v7 = vadd.f32 %v327_v60, %v319_v1  ;;  %v330_v13 = vadd.f32 %v328_v63, %v320_v4  ;;  %v428_v63 = vmul.f32 %v1061_v49, %v848_v0  ;;  %v878_v1 = vld [vmem:[%s1473_s3 + $0xc] sm:$0xff]  ;;  %v1071_v49 = vld [vmem:[%s1452_s22 + $0x1c] ss:$0 sm:$0xff] }
  0x5c   : >> { %v447_v58 = vmul.f32 %v1063_v61, %v878_v1 }
  0x5d   : >> { %v339_v16 = vadd.f32 %v337_v2, %v329_v7  ;;  %v340_v20 = vadd.f32 %v338_v5, %v330_v13  ;;  %v438_v5 = vmul.f32 %v1062_v55, %v851_v6  ;;  %v881_v7 = vld [vmem:[%s1473_s3 + $0xb] sm:$0xff]  ;;  %v1072_v55 = vld [vmem:[%s1452_s22 + $0x1d] ss:$0 sm:$0xff] }
  0x5e   : >> { %v457_v0 = vmul.f32 %v1064_v3, %v881_v7 }
  0x5f   : >> { %v349_v25 = vadd.f32 %v347_v8, %v339_v16  ;;  %v350_v27 = vadd.f32 %v348_v14, %v340_v20  ;;  %v448_v14 = vmul.f32 %v1063_v61, %v854_v15  ;;  %v884_v16 = vld [vmem:[%s1473_s3 + $0xa] sm:$0xff] }
  0x60   : >> { %v467_v6 = vmul.f32 %v1065_v9, %v884_v16 }
  0x61   : >> { %v359_v17 = vadd.f32 %v357_v18, %v349_v25  ;;  %v360_v33 = vadd.f32 %v358_v21, %v350_v27  ;;  %v458_v21 = vmul.f32 %v1064_v3, %v857_v23  ;;  %v887_v25 = vld [vmem:[%s1473_s3 + $0x9] sm:$0xff] }
  0x62   : >> { %v477_v15 = vmul.f32 %v1066_v19, %v887_v25 }
  0x63   : >> { %v369_v35 = vadd.f32 %v367_v12, %v359_v17  ;;  %v370_v39 = vadd.f32 %v368_v28, %v360_v33  ;;  %v468_v28 = vmul.f32 %v1065_v9, %v860_v29  ;;  %v890_v17 = vld [vmem:[%s1473_s3 + $0x8] sm:$0xff] }
  0x64   : >> { %v487_v23 = vmul.f32 %v1067_v26, %v890_v17 }
  0x65   : >> { %v379_v24 = vadd.f32 %v377_v31, %v369_v35  ;;  %v380_v44 = vadd.f32 %v378_v34, %v370_v39  ;;  %v478_v34 = vmul.f32 %v1066_v19, %v863_v22  ;;  %v893_v35 = vld [vmem:[%s1473_s3 + $0x7] sm:$0xff] }
  0x66   : >> { %v497_v29 = vmul.f32 %v1068_v32, %v893_v35 }
  0x67   : >> { %v389_v48 = vadd.f32 %v387_v36, %v379_v24  ;;  %v390_v50 = vadd.f32 %v388_v40, %v380_v44  ;;  %v488_v40 = vmul.f32 %v1067_v26, %v866_v41  ;;  %v896_v24 = vld [vmem:[%s1473_s3 + $0x6] sm:$0xff] }
  0x68   : >> { %v507_v22 = vmul.f32 %v1069_v37, %v896_v24 }
  0x69   : >> { %v399_v54 = vadd.f32 %v397_v42, %v389_v48  ;;  %v400_v56 = vadd.f32 %v398_v46, %v390_v50  ;;  %v498_v46 = vmul.f32 %v1068_v32, %v869_v47  ;;  %v899_v48 = vld [vmem:[%s1473_s3 + $0x5] sm:$0xff]  ;;  %v1073_v47 = vld [vmem:[%s1452_s22 + $0x1e] ss:$0 sm:$0xff] }
  0x6a   : >> { %v517_v41 = vmul.f32 %v1070_v43, %v899_v48 }
  0x6b   : >> { %v409_v60 = vadd.f32 %v407_v30, %v399_v54  ;;  %v410_v62 = vadd.f32 %v408_v51, %v400_v56  ;;  %v508_v51 = vmul.f32 %v1069_v37, %v872_v53  ;;  %v902_v54 = vld [vmem:[%s1473_s3 + $0x4] sm:$0xff] }
  0x6c   : >> { %v527_v61 = vmul.f32 %v1071_v49, %v902_v54 }
  0x6d   : >> { %v419_v2 = vadd.f32 %v417_v38, %v409_v60  ;;  %v420_v4 = vadd.f32 %v418_v57, %v410_v62  ;;  %v518_v57 = vmul.f32 %v1070_v43, %v875_v59  ;;  %v905_v60 = vld [vmem:[%s1473_s3 + $0x3] sm:$0xff] }
  0x6e   : >> { %v537_v3 = vmul.f32 %v1072_v55, %v905_v60 }
  0x6f   : >> { %v429_v8 = vadd.f32 %v427_v45, %v419_v2  ;;  %v430_v13 = vadd.f32 %v428_v63, %v420_v4  ;;  %v528_v63 = vmul.f32 %v1071_v49, %v878_v1  ;;  %v908_v2 = vld [vmem:[%s1473_s3 + $0x2] sm:$0xff]  ;;  %v1074_v4 = vld [vmem:[%s1452_s22 + $0x1f] ss:$0 sm:$0xff] }
  0x70   : >> { %v547_v9 = vmul.f32 %v1073_v47, %v908_v2  ;;  %v558_v19 = vmul.f32 %v1074_v4, %v887_v25 }
  0x71   : >> { %v439_v18 = vadd.f32 %v437_v52, %v429_v8  ;;  %v440_v20 = vadd.f32 %v438_v5, %v430_v13  ;;  %v538_v5 = vmul.f32 %v1072_v55, %v881_v7  ;;  %v911_v8 = vld [vmem:[%s1473_s3 + $0x1] sm:$0xff] }
  0x73   : >> { %v449_v12 = vadd.f32 %v447_v58, %v439_v18  ;;  %v450_v27 = vadd.f32 %v448_v14, %v440_v20  ;;  %v548_v14 = vmul.f32 %v1073_v47, %v884_v16  ;;  %v557_v18 = vmul.f32 %v1074_v4, %v911_v8 }
  0x75   : >> { %v459_v31 = vadd.f32 %v457_v0, %v449_v12  ;;  %v460_v33 = vadd.f32 %v458_v21, %v450_v27 }
  0x77   : >> { %v469_v36 = vadd.f32 %v467_v6, %v459_v31  ;;  %v470_v39 = vadd.f32 %v468_v28, %v460_v33 }
  0x79   : >> { %v479_v42 = vadd.f32 %v477_v15, %v469_v36  ;;  %v480_v44 = vadd.f32 %v478_v34, %v470_v39 }
  0x7b   : >> { %v489_v30 = vadd.f32 %v487_v23, %v479_v42  ;;  %v490_v50 = vadd.f32 %v488_v40, %v480_v44 }
  0x7d   : >> { %v499_v38 = vadd.f32 %v497_v29, %v489_v30  ;;  %v500_v56 = vadd.f32 %v498_v46, %v490_v50 }
  0x7f   : >> { %v509_v45 = vadd.f32 %v507_v22, %v499_v38  ;;  %v510_v62 = vadd.f32 %v508_v51, %v500_v56 }
  0x81   : >> { %v519_v52 = vadd.f32 %v517_v41, %v509_v45  ;;  %v520_v53 = vadd.f32 %v518_v57, %v510_v62 }
  0x83   : >> { %v529_v58 = vadd.f32 %v527_v61, %v519_v52  ;;  %v530_v13 = vadd.f32 %v528_v63, %v520_v53 }
  0x85   : >> { %v539_v59 = vadd.f32 %v537_v3, %v529_v58  ;;  %v540_v0 = vadd.f32 %v538_v5, %v530_v13 }
  0x87   : >> { %v549_v20 = vadd.f32 %v547_v9, %v539_v59  ;;  %v550_v21 = vadd.f32 %v548_v14, %v540_v0 }
  0x89   : >> { %v559_v1 = vadd.f32 %v557_v18, %v549_v20  ;;  %v560_v12 = vadd.f32 %v558_v19, %v550_v21 }
  0x8a   : > { %238 = sbr.rel (!%p236_p6) target bundleno = 67 (0x43), region = 127 }
  0x8b   : >> { %v564_v6 = vadd.f32 %v1476_v10, %v559_v1  ;;  %v565_v26 = vadd.f32 %v1479_v11, %v560_v12 }
  0x8d   : >> { %567 = vst [vmem:[%s566_s25] sm:$0xff] %v564_v6 }
  0x8e   : >> { %568 = vst [vmem:[%s566_s25 + $0x8] sm:$0xff] %v565_v26 }
  0x8f   : > { %1162 = shalt.err (!%p1159_p10)
}
  0x90   : > { %s1275_s27 = smov 128   ;;  %s1276_s3 = smov 256  }
  0x91   : > { %s1277_s25 = smov 8  }
  0x92   : > { %925 = dma.vmem_to_hbm [thread:$0]  (%p1381_p9), %s584_s4, 512, %s586_s17, %s570_s8, %s1275_s27, %s1276_s3, %s1277_s25  }
  0x93 PF: > { %p939_p3 = scmp.ge.s32.totalorder %s1265_s19, 2  ;;  %s600_s30 = sand.u32 1, %s1237_s12  }
  0x94   : > { %s601_s9 = scalar_lea.sflag [#allocation5], %s600_s30 }
  0x95   : > { %p935_p12 = pnand %p939_p3, %p1391_p13 }
  0x97   : > { %p936_p11 = pneg %p935_p12 }
  0x99   : > { %1220 = dma.done.wait (%p936_p11), %s601_s9, 512  }
  0x9a   : > { %1222 = vsyncadd (%p936_p11), %s601_s9, 4294966784  ;;  %s21_s19 = sadd.s32 1, %s1265_s19   ;;  %s1642_s15 = sld [smem:[#allocation12_spill]] }
  0x9b   : > { %p18_p2 = scmp.ge.s32.totalorder %s21_s19, 6   ;;  %s1643_s17 = sld [smem:[#allocation13_spill]] }
  0x9c   : > { %s1644_s29 = sld [smem:[#allocation14_spill]]  ;;  %s1645_s9 = smov %s1229_s10 }
  0x9d   : > { %s1646_s10 = smov %s1233_s11  ;;  %s1647_s11 = smov %s1421_s26 }
  0x9e   : > { %s1648_s12 = smov %s1241_s13  ;;  %s1649_s13 = smov %s1245_s14 }
  0x9f   : > { %s1650_s14 = smov %s1397_s5  ;;  %s1651_s16 = smov %s1261_s18 }
  0xa0   :  { %20 = sbr.rel (!%p18_p2) target bundleno = 13 (0xd), region = 138 }
  0xa2   : > { %s1652_s18 = smov %s1644_s29 }
  0xa5   :  { %607 = vsyncpa [#allocation4], 1 }
  0xa6   :  { %609 = vsyncpa [#allocation4 + $0x1], 1 }
  0xa7   :  { %610 = vsyncpa [#allocation7], 1 }
  0xa8   :  { %612 = vsyncpa [#allocation7 + $0x1], 1 }
  0xa9   :  { %613 = vsyncpa [#allocation5], 1 }
  0xaa   :  { %615 = vsyncpa [#allocation5 + $0x1], 1 }

</bundles_post_ra>
